<compile_context>
chip_gen: v6e
topology: v6e:2x2x1
jax: 0.10.0
libtpu: 0.0.40
codegen_flags: <defaults>
</compile_context>

<pallas_src>
import jax
import jax.numpy as jnp
from jax.experimental import pallas as pl
from jax.experimental.pallas import tpu as pltpu

LANES = 128  # TPU vreg lane width


# ----------------------------------------------------------------------------
# Pallas kernel: fused 1x1 conv + bias + NCHW->NHWC layout change
# ----------------------------------------------------------------------------
def _bbox_head_kernel(x_ref, w_ref, b_ref, o_ref):
    # x_ref: (1, C, TM)   NCHW features, spatial dims flattened to TM
    # w_ref: (C, KP)      1x1-conv weight, transposed & zero-padded to KP=128
    # b_ref: (1, K)       bias (real width only)
    # o_ref: (1, TM, K)   output in (position, channel) = NHWC order, real K
    x = x_ref[0]                                          # (C, TM)
    # Contract over C with the LHS transposed: (TM, C) @ (C, KP) on the MXU.
    # This folds the NCHW -> NHWC permute into the matmul itself.
    y = jax.lax.dot_general(
        x, w_ref[...],
        dimension_numbers=(((0,), (0,)), ((), ())),
        preferred_element_type=jnp.float32,
        precision=jax.lax.Precision.HIGHEST)              # (TM, KP) f32
    k = o_ref.shape[-1]
    # Store only the K real channels: no 128-lane write amplification to HBM.
    o_ref[0] = (y[:, :k] + b_ref[...]).astype(o_ref.dtype)


# ----------------------------------------------------------------------------
# M-axis tiling: big lane-aligned strips, >=2 strips when M allows (v7x megacore)
# ----------------------------------------------------------------------------
def _m_tiling(m, c, itemsize=4):
    """Returns (tm, num_strips, m_padded)."""
    # Keep one (C, tm) input block around <= 8 MiB (double-buffered it is
    # still comfortably inside the 32 MiB default scoped VMEM on v6e/v7x).
    cap = max(LANES, min(8192, ((8 << 20) // (itemsize * c)) // LANES * LANES))
    if m < 2 * LANES:
        # Tiny map: single full-M block (block dim == full dim is always legal).
        return m, 1, m
    nm = max(2, pl.cdiv(m, cap))                 # >=2 strips -> feeds both v7x TCs
    tm = pl.cdiv(pl.cdiv(m, nm), LANES) * LANES  # lane-aligned strip width
    nm = pl.cdiv(m, tm)
    return tm, nm, nm * tm


# ----------------------------------------------------------------------------
# Wrapper
# ----------------------------------------------------------------------------
def bbox_head_forward(x_nchw, w_kc, b_k):
    """Pallas BboxHead forward.

    x_nchw: (B, C, H, W) feature map (NCHW, PyTorch convention)
    w_kc  : (K, C)  1x1-conv weight (PyTorch (K, C, 1, 1) squeezed), K = 4*A
    b_k   : (K,)    conv bias
    returns (B, H*W*A, 4)
    """
    B, C, H, W = x_nchw.shape
    K = int(w_kc.shape[0])
    A = K // 4
    M = H * W
    KP = max(LANES, pl.cdiv(K, LANES) * LANES)   # lane-dense MXU rhs width

    cdt = x_nchw.dtype                           # bf16 inputs stay bf16
    # Pad the tiny weight to 128 output lanes (VMEM-side only; K*C elems).
    w_pad = jnp.zeros((C, KP), cdt).at[:, :K].set(w_kc.astype(cdt).T)
    b2 = b_k.astype(jnp.float32).reshape(1, K)

    x3 = x_nchw.reshape(B, C, M)                 # contiguous -> metadata reshape
    tm, nm, m_pad = _m_tiling(M, C, jnp.dtype(cdt).itemsize)
    if m_pad != M:
        # Ragged M: zero-pad the flattened spatial axis up to a strip multiple.
        x3 = jnp.pad(x3, ((0, 0), (0, 0), (0, m_pad - M)))

    out = pl.pallas_call(
        _bbox_head_kernel,
        out_shape=jax.ShapeDtypeStruct((B, m_pad, K), cdt),
        grid=(B, nm),
        in_specs=[
            pl.BlockSpec((1, C, tm), lambda b, m: (b, 0, m)),
            pl.BlockSpec((C, KP), lambda b, m: (0, 0)),
            pl.BlockSpec((1, K), lambda b, m: (0, 0)),
        ],
        out_specs=pl.BlockSpec((1, tm, K), lambda b, m: (b, m, 0)),
        compiler_params=pltpu.CompilerParams(
            dimension_semantics=("parallel", "parallel")),
    )(x3, w_pad, b2)

    if m_pad != M:
        out = out[:, :M, :]
    # permute(0,2,3,1).view(B,-1,4) is now a plain reshape: the kernel already
    # wrote NHWC-ordered rows of width K = 4*A.
    return out.reshape(B, M * A, 4)


# ----------------------------------------------------------------------------
# Pure-JAX reference (mirrors the PyTorch module exactly)
# ----------------------------------------------------------------------------
def bbox_head_ref(x_nchw, w_kc, b_k):
    B, C, H, W = x_nchw.shape
    out = jnp.einsum("bchw,kc->bkhw", x_nchw, w_kc,
                     precision=jax.lax.Precision.HIGHEST)
    out = out + b_k[None, :, None, None]
    out = jnp.transpose(out, (0, 2, 3, 1))                # NCHW -> NHWC
    return out.reshape(B, -1, 4)


if __name__ == "__main__":
    key = jax.random.PRNGKey(0)
    k_x1, k_x2, k_x3, k_w, k_b = jax.random.split(key, 5)

    # Small shapes consistent with the module: batch=2, inchannels=64,
    # num_anchors=3 (PyTorch default).  Three spatial sizes exercise the
    # 2-strip path (16x16 -> M=256), the single-block path (8x8 -> M=64),
    # and the ragged / padded path (20x13 -> M=260).
    B, C, A = 2, 64, 3
    K = 4 * A
    w = 0.05 * jax.random.normal(k_w, (K, C), jnp.float32)
    b = 0.05 * jax.random.normal(k_b, (K,), jnp.float32)

    fwd = jax.jit(bbox_head_forward)

    for kx, (H, W) in zip((k_x1, k_x2, k_x3), ((16, 16), (8, 8), (20, 13))):
        x = jax.random.normal(kx, (B, C, H, W), jnp.float32)
        out = jax.block_until_ready(fwd(x, w, b))
        ref = bbox_head_ref(x, w, b)
        assert out.shape == (B, H * W * A, 4), out.shape
        assert jnp.allclose(out, ref, atol=1e-4, rtol=1e-4), \
            f"mismatch vs reference for H,W=({H},{W})"

    print("KERNEL_OK")
</pallas_src>

<mosaic_0001>
module attributes {stable_mosaic.version = 11 : i64} {
  func.func @_bbox_head_kernel(%arg0: i32, %arg1: i32, %arg2: memref<1x64x128xf32, #tpu.memory_space<vmem>>, %arg3: memref<64x128xf32, #tpu.memory_space<vmem>>, %arg4: memref<1x12xf32, #tpu.memory_space<vmem>>, %arg5: memref<1x128x12xf32, #tpu.memory_space<vmem>>) attributes {dimension_semantics = [#tpu.dimension_semantics<parallel>, #tpu.dimension_semantics<parallel>], iteration_bounds = array<i64: 2, 2>, scalar_prefetch = 0 : i64, scratch_operands = 0 : i64, tpu.core_type = #tpu.core_type<tc>, window_params = [{transform_indices = @transform_0, window_bounds = array<i64: 1, 64, 128>}, {pipeline_mode = #tpu.pipeline_mode<synchronous>, transform_indices = @transform_1, window_bounds = array<i64: 64, 128>}, {pipeline_mode = #tpu.pipeline_mode<synchronous>, transform_indices = @transform_2, window_bounds = array<i64: 1, 12>}, {transform_indices = @transform_3, window_bounds = array<i64: 1, 128, 12>}]} {
    %c0 = arith.constant 0 : index
    %c0_0 = arith.constant 0 : index
    %c0_1 = arith.constant 0 : index
    %0 = vector.load %arg2[%c0, %c0_0, %c0_1] : memref<1x64x128xf32, #tpu.memory_space<vmem>>, vector<1x64x128xf32>
    %1 = vector.shape_cast %0 : vector<1x64x128xf32> to vector<64x128xf32>
    %c0_2 = arith.constant 0 : index
    %c0_3 = arith.constant 0 : index
    %2 = vector.load %arg3[%c0_2, %c0_3] : memref<64x128xf32, #tpu.memory_space<vmem>>, vector<64x128xf32>
    %cst = arith.constant dense<0.000000e+00> : vector<128x128xf32>
    %3 = tpu.matmul %1, %2, %cst {dimension_numbers = #tpu.dot_dimension_numbers<[0], [0], [1], [1], [0, 1, 1, 1], [], []>, precision = #tpu.contract_precision<fp32>} : vector<64x128xf32>, vector<64x128xf32>, vector<128x128xf32> -> vector<128x128xf32>
    %4 = vector.extract_strided_slice %3 {offsets = [0, 0], sizes = [128, 12], strides = [1, 1]} : vector<128x128xf32> to vector<128x12xf32>
    %c0_4 = arith.constant 0 : index
    %c0_5 = arith.constant 0 : index
    %5 = vector.load %arg4[%c0_4, %c0_5] : memref<1x12xf32, #tpu.memory_space<vmem>>, vector<1x12xf32>
    %6 = vector.broadcast %5 : vector<1x12xf32> to vector<128x12xf32>
    %7 = arith.addf %4, %6 : vector<128x12xf32>
    %c0_6 = arith.constant 0 : index
    %c0_7 = arith.constant 0 : index
    %c0_8 = arith.constant 0 : index
    %8 = vector.load %arg5[%c0_6, %c0_7, %c0_8] : memref<1x128x12xf32, #tpu.memory_space<vmem>>, vector<1x128x12xf32>
    %9 = vector.shape_cast %8 : vector<1x128x12xf32> to vector<128x12xf32>
    %10 = vector.shape_cast %7 : vector<128x12xf32> to vector<1x128x12xf32>
    tpu.vector_store %arg5[%c0_6, %c0_7, %c0_8], %10 {strides = array<i32>} : memref<1x128x12xf32, #tpu.memory_space<vmem>>, vector<1x128x12xf32>,
    return
  }
  func.func @transform_0(%arg0: i32, %arg1: i32) -> (i32, i32, i32) {
    %c0_i32 = arith.constant 0 : i32
    %c0_i32_0 = arith.constant 0 : i32
    return %arg0, %c0_i32, %arg1 : i32, i32, i32
  }
  func.func @transform_1(%arg0: i32, %arg1: i32) -> (i32, i32) {
    %c0_i32 = arith.constant 0 : i32
    %c0_i32_0 = arith.constant 0 : i32
    %c0_i32_1 = arith.constant 0 : i32
    return %c0_i32, %c0_i32_0 : i32, i32
  }
  func.func @transform_2(%arg0: i32, %arg1: i32) -> (i32, i32) {
    %c0_i32 = arith.constant 0 : i32
    %c0_i32_0 = arith.constant 0 : i32
    %c0_i32_1 = arith.constant 0 : i32
    return %c0_i32, %c0_i32_0 : i32, i32
  }
  func.func @transform_3(%arg0: i32, %arg1: i32) -> (i32, i32, i32) {
    %c0_i32 = arith.constant 0 : i32
    %c0_i32_0 = arith.constant 0 : i32
    return %arg0, %arg1, %c0_i32 : i32, i32, i32
  }
}

</mosaic_0001>

<bundles_post_ra>
// kernel: bbox_head_forward.1
= control target key start
LH: loop header
LB: loop body
LE: loop exit
PB: predicated region body
PF: predicated region fallthrough
CT: control target
= control target key end

     0   :  { %s2204_s12 = smov 0   ;;  %s2206_s13 = smov 0   ;;  %s2959_s0 = inlined_call_operand.vmem [shape: f32[2,64,256], index: 0, kind: input, shape index: {}]   ;;  %s2960_s1 = inlined_call_operand.vmem [shape: f32[64,128], index: 1, kind: input, shape index: {}]   ;;  %s2961_s2 = inlined_call_operand.vmem [shape: f32[1,12], index: 2, kind: input, shape index: {}]   ;;  %s2962_s3 = inlined_call_operand.vmem [shape: f32[2,256,12], index: 3, kind: output, shape index: {}]  }
   0x1   :  { %s2208_s14 = smov 0   ;;  %s2210_s15 = smov 0  }
   0x2   :  { %s2212_s16 = smov 0   ;;  %s2214_s17 = smov 0  }
   0x3   :  { %s2216_s18 = smov 0  }
   0x4 LB: > { %s22_s19 = sadd.s32 1, %s2174_s16  ;;  %s25_s20 = sadd.s32 1, %s2178_s17  ;;  %s2182_s18 = sphi %s2216_s18, %s13_s18   ;;  %s2178_s17 = sphi %s2214_s17, %s3004_s17   ;;  %s2174_s16 = sphi %s2212_s16, %s3003_s16   ;;  %s2170_s15 = sphi %s2210_s15, %s3002_s15   ;;  %s2166_s14 = sphi %s2208_s14, %s3001_s14   ;;  %s2162_s13 = sphi %s2206_s13, %s3000_s13   ;;  %s2158_s12 = sphi %s2204_s12, %s2999_s12  }
   0x5   : > { %p23_p0 = scmp.ge.s32.totalorder %s22_s19, 2  ;;  %p41_p1 = scmp.ne.s32.totalorder %s2162_s13, %s2158_s12 }
   0x6   : > { %p42_p2 = scmp.eq.s32.totalorder %s2182_s18, 0  ;;  %s34_s24 = sadd.s32 1, %s2162_s13 }
   0x7   : > { %s3006_s19 = smov (%p23_p0, %s22_s19), 0  ;;  %s3008_s20 = smov (!%p23_p0, %s25_s20), %s2178_s17 }
   0x8   : > { %p43_p3 = por %p42_p2, %p41_p1  ;;  %p27_p4 = scmp.ge.s32.totalorder %s3008_s20, 2 }
   0x9   : > { %s30_s21 = ssub.s32 %s2174_s16, %s3006_s19  ;;  %p1675_p6 = scmp.ge.s32.totalorder %s2182_s18, 4 }
   0xa   : > { %s3010_s20 = smov (%p27_p4, %s3008_s20), 0 }
   0xb   : > { %s29_s22 = ssub.s32 %s2178_s17, %s3010_s20  ;;  %143 = sbr.rel (%p1675_p6) target bundleno = 26 (0x1a), region = 24 }
   0xc   : > { %s31_s23 = sor.u32 %s30_s21, %s29_s22 }
   0xd   : > { %p32_p5 = scmp.eq.s32.totalorder %s31_s23, 0 }
   0xf   : > { %s2255_s25 = scalar_select %p32_p5, %s2162_s13, %s34_s24  }
  0x10   : > { %146 = sbr.rel (!%p43_p3) target bundleno = 26 (0x1a), region = 28  ;;  %s148_s26 = sand.u32 (%p43_p3), 1, %s2162_s13  }
  0x11   : > { %s1677_s27 = sshll.u32 (%p43_p3), %s2178_s17, 4  ;;  %s1676_s28 = sshll.u32 (%p43_p3), %s148_s26, 6 }
  0x12   : > { %s152_s29 = sadd.s32 (%p43_p3), %s2174_s16, %s1677_s27  ;;  %s150_s7 = scalar_lea.vmem (%p43_p3), [#allocation2], %s1676_s28 }
  0x13   : > { %s1678_s30 = sshll.u32 (%p43_p3), %s152_s29, 3 }
  0x14   : > { %s154_s6 = scalar_lea.vmem (%p43_p3), %s2959_s0, %s1678_s30 }
  0x15   : > { %v197_v0 = vld [vmem:[%s154_s6] sm:$0xff]  ;;  %v199_v1 = vld [vmem:[%s154_s6 + $0x10] sm:$0xff] }
  0x16   : > { %v201_v2 = vld [vmem:[%s154_s6 + $0x20] sm:$0xff]  ;;  %198 = vst [vmem:[%s150_s7] sm:$0xff] %v197_v0  ;;  %200 = vst [vmem:[%s150_s7 + $0x8] sm:$0xff] %v199_v1  ;;  %v203_v3 = vld [vmem:[%s154_s6 + $0x30] sm:$0xff] }
  0x17   : > { %202 = vst [vmem:[%s150_s7 + $0x10] sm:$0xff] %v201_v2  ;;  %v205_v4 = vld [vmem:[%s154_s6 + $0x40] sm:$0xff]  ;;  %v207_v5 = vld [vmem:[%s154_s6 + $0x50] sm:$0xff]  ;;  %204 = vst [vmem:[%s150_s7 + $0x18] sm:$0xff] %v203_v3 }
  0x18   : > { %206 = vst [vmem:[%s150_s7 + $0x20] sm:$0xff] %v205_v4  ;;  %208 = vst [vmem:[%s150_s7 + $0x28] sm:$0xff] %v207_v5  ;;  %v209_v6 = vld [vmem:[%s154_s6 + $0x60] sm:$0xff]  ;;  %v211_v7 = vld [vmem:[%s154_s6 + $0x70] sm:$0xff] }
  0x19   : > { %210 = vst [vmem:[%s150_s7 + $0x30] sm:$0xff] %v209_v6  ;;  %212 = vst [vmem:[%s150_s7 + $0x38] sm:$0xff] %v211_v7 }
  0x1a PF: > { %p1679_p7 = scmp.ge.s32.totalorder %s2182_s18, 1  ;;  %p217_p8 = scmp.lt.s32.totalorder %s2182_s18, 5 }
  0x1c   : > { %p218_p9 = pnand %p1679_p7, %p217_p8 }
  0x1e   : > { %221 = sbr.rel (%p218_p9) target bundleno = 501 (0x1f5), region = 66 }
  0x23   : > { %s224_s8 = sand.u32 1, %s2158_s12   ;;  %v276_v8 = vld [vmem:[%s2960_s1 + $0x38] sm:$0xff]  ;;  %v275_v9 = vld [vmem:[%s2960_s1 + $0x30] sm:$0xff]  ;;  %v274_v10 = vld [vmem:[%s2960_s1 + $0x28] sm:$0xff]  ;;  %vm309_vm0 = vcmask 523264   ;;  %s1681_s9 = sshll.u32 %s2166_s14, 4 }
  0x24   : > { %s1680_s24 = sshll.u32 %s224_s8, 6  ;;  %v2276_v11 = vand.u32 4294901760, %v276_v8  ;;  %v2278_v12 = vand.u32 4294901760, %v275_v9  ;;  %v2280_v13 = vand.u32 4294901760, %v274_v10  ;;  %v273_v14 = vld [vmem:[%s2960_s1 + $0x20] sm:$0xff]  ;;  %v272_v15 = vld [vmem:[%s2960_s1 + $0x18] sm:$0xff] }
  0x25   : > { %v2288_v16 = vand.u32 4294901760, %v273_v14  ;;  %v2290_v17 = vand.u32 4294901760, %v272_v15  ;;  %v271_v18 = vld [vmem:[%s2960_s1 + $0x10] sm:$0xff]  ;;  %v270_v19 = vld [vmem:[%s2960_s1 + $0x8] sm:$0xff]  ;;  %v269_v20 = vld [vmem:[%s2960_s1] sm:$0xff]  ;;  %s2301_s8 = scalar_lea.vmem [#allocation2], %s1680_s24 }
  0x26   : > { %v261_v21 = vld [vmem:[%s2301_s8] sm:$0xff]  ;;  %v2305_v22 = vsub.f32 %v276_v8, %v2276_v11  ;;  %v2308_v23 = vsub.f32 %v275_v9, %v2278_v12  ;;  %v2311_v24 = vsub.f32 %v274_v10, %v2280_v13  ;;  %1831 = vmatprep.subr.mxu0 %v2276_v11  ;;  %v2314_v25 = vand.u32 4294901760, %v271_v18  ;;  %v262_v30 = vld [vmem:[%s2301_s8 + $0x8] sm:$0xff]  ;;  %v263_v42 = vld [vmem:[%s2301_s8 + $0x10] sm:$0xff]  ;;  %p252_p10 = scmp.lt.s32.totalorder %s2170_s15, 1  ;;  %p254_p11 = scmp.lt.s32.totalorder %s1681_s9, 31 }
  0x27   : > { %277 = vxpose.xlu0.b32.start [1/8] (short) %v261_v21, 128  ;;  %v2317_v26 = vsub.f32 %v273_v14, %v2288_v16  ;;  %v2320_v27 = vsub.f32 %v272_v15, %v2290_v17  ;;  %1832 = vmatpush3.msra.mxu0 %v2276_v11  ;;  %v2323_v28 = vand.u32 4294901760, %v270_v19  ;;  %v2325_v29 = vand.u32 4294901760, %v269_v20  ;;  %v264_v50 = vld [vmem:[%s2301_s8 + $0x18] sm:$0xff]  ;;  %v265_v56 = vld [vmem:[%s2301_s8 + $0x20] sm:$0xff]  ;;  %v266_v60 = vld [vmem:[%s2301_s8 + $0x28] sm:$0xff] }
  0x28   : > { %v2329_v31 = vand.u32 4294901760, %v2305_v22  ;;  %v2332_v32 = vand.u32 4294901760, %v2308_v23  ;;  %v2335_v33 = vand.u32 4294901760, %v2311_v24  ;;  %1833 = vmatprep.subr.mxu0 %v2278_v12  ;;  %v2339_v34 = vsub.f32 %v271_v18, %v2314_v25  ;;  %v267_v62 = vld [vmem:[%s2301_s8 + $0x30] sm:$0xff]  ;;  %v268_v63 = vld [vmem:[%s2301_s8 + $0x38] sm:$0xff]  ;;  %s3012_s15 = smov (!%p252_p10, %s2170_s15), 1 }
  0x29   : > { %v2342_v35 = vand.u32 4294901760, %v2317_v26  ;;  %v2345_v36 = vand.u32 4294901760, %v2320_v27  ;;  %1834 = vmatpush3.msra.mxu0 %v2278_v12  ;;  %v2356_v40 = vsub.f32 %v270_v19, %v2323_v28  ;;  %v2360_v41 = vsub.f32 %v269_v20, %v2325_v29  ;;  %s3014_s9 = smov (!%p254_p11, %s1681_s9), 31  ;;  %s1682_s14 = sshll.u32 %s3012_s15, 5 }
  0x2a   : > { %v611_v37 = vsub.f32 %v2305_v22, %v2329_v31  ;;  %v618_v38 = vsub.f32 %v2308_v23, %v2332_v32  ;;  %v625_v39 = vsub.f32 %v2311_v24, %v2335_v33  ;;  %1835 = vmatprep.subr.mxu0 %v2280_v13  ;;  %v2366_v46 = vand.u32 4294901760, %v2339_v34  ;;  %s257_s10 = sadd.s32 %s1682_s14, %s3014_s9 }
  0x2b   : > { %278 = vxpose.xlu0.b32.cont [2/8] (short) %v262_v30, 128  ;;  %1836 = vmatpush3.msra.mxu0 %v2280_v13  ;;  %v632_v45 = vsub.f32 %v2317_v26, %v2342_v35  ;;  %v639_v48 = vsub.f32 %v2320_v27, %v2345_v36  ;;  %v2373_v49 = vand.u32 4294901760, %v2356_v40  ;;  %v2380_v53 = vand.u32 4294901760, %v2360_v41  ;;  %s1683_s15 = sshll.u32 %s257_s10, 3 }
  0x2c   : > { %v612_v43 = vand.u32 4294901760, %v611_v37  ;;  %v619_v44 = vand.u32 4294901760, %v618_v38  ;;  %1837 = vmatprep.subr.mxu0 %v2288_v16  ;;  %v626_v47 = vand.u32 4294901760, %v625_v39  ;;  %v646_v52 = vsub.f32 %v2339_v34, %v2366_v46  ;;  %s2847_s24 = scalar_lea.vmem %s2962_s3, %s1683_s15 }
  0x2d   : > { %1838 = vmatpush3.msra.mxu0 %v2288_v16  ;;  %v633_v51 = vand.u32 4294901760, %v632_v45  ;;  %v640_v54 = vand.u32 4294901760, %v639_v48  ;;  %v653_v55 = vsub.f32 %v2356_v40, %v2373_v49  ;;  %v660_v58 = vsub.f32 %v2360_v41, %v2380_v53 }
  0x2e   : > { %1871 = vmatprep.subr.mxu1 %v612_v43  ;;  %1839 = vmatprep.subr.mxu0 %v2290_v17  ;;  %v647_v57 = vand.u32 4294901760, %v646_v52  ;;  %vm1563_vm1 = vcmask 97280  }
  0x2f   : > { %279 = vxpose.xlu0.b32.cont [3/8] (short) %v263_v42, 128  ;;  %1872 = vmatpush3.msra.mxu1 %v612_v43  ;;  %v654_v59 = vand.u32 4294901760, %v653_v55  ;;  %v661_v61 = vand.u32 4294901760, %v660_v58 }
  0x30   : > { %1873 = vmatprep.subr.mxu1 %v619_v44  ;;  %1840 = vmatpush3.msra.mxu0 %v2290_v17 }
  0x31   : > { %1874 = vmatpush3.msra.mxu1 %v619_v44  ;;  %1841 = vmatprep.subr.mxu0 %v2314_v25 }
  0x32   : > { %1875 = vmatprep.subr.mxu1 %v626_v47  ;;  %1842 = vmatpush3.msra.mxu0 %v2314_v25 }
  0x33   : > { %280 = vxpose.xlu0.b32.cont [4/8] (short) %v264_v50, 128  ;;  %1876 = vmatpush3.msra.mxu1 %v626_v47 }
  0x34   : > { %1877 = vmatprep.subr.mxu1 %v633_v51  ;;  %1843 = vmatprep.subr.mxu0 %v2323_v28 }
  0x35   : > { %1878 = vmatpush3.msra.mxu1 %v633_v51  ;;  %1844 = vmatpush3.msra.mxu0 %v2323_v28 }
  0x36   : > { %1879 = vmatprep.subr.mxu1 %v640_v54  ;;  %1845 = vmatprep.subr.mxu0 %v2325_v29 }
  0x37   : > { %281 = vxpose.xlu0.b32.cont [5/8] (short) %v265_v56, 128  ;;  %1880 = vmatpush3.msra.mxu1 %v640_v54 }
  0x38   : > { %1881 = vmatprep.subr.mxu1 %v647_v57  ;;  %1846 = vmatpush3.msra.mxu0 %v2325_v29 }
  0x39   : > { %1882 = vmatpush3.msra.mxu1 %v647_v57  ;;  %1911 = vmatprep.subr.mxu0 %v2305_v22 }
  0x3a   : > { %1883 = vmatprep.subr.mxu1 %v654_v59 }
  0x3b   : > { %282 = vxpose.xlu0.b32.cont [6/8] (short) %v266_v60, 128  ;;  %1884 = vmatpush3.msra.mxu1 %v654_v59 }
  0x3c   : > { %1885 = vmatprep.subr.mxu1 %v661_v61 }
  0x3d   : > { %1886 = vmatpush3.msra.mxu1 %v661_v61 }
  0x3e   : > { %1951 = vmatprep.subr.mxu1 %v2276_v11 }
  0x3f   : > { %283 = vxpose.xlu0.b32.cont [7/8] (short) %v267_v62, 128 }
  0x43   : > { %284 = vxpose.xlu0.b32.end [8/8] (short) %v268_v63, 128 }
  0xa3   : > { %v293_v0 = vpop.trf.xlu0 }
  0xa4   : > { %v311_v1 = vsel %vm309_vm0, %v293_v0, 0 }
  0xa5   : > { %v2400_v2 = vand.u32 4294901760, %v311_v1 }
  0xa7   : > { %v2403_v3 = vsub.f32 %v311_v1, %v2400_v2  ;;  %1887 = vmatprep.mubr.f32.mxu1 %v2400_v2  ;;  %v294_v4 = vpop.trf.xlu0 }
  0xa8   : > { %v314_v5 = vsel %vm309_vm0, %v294_v4, 0 }
  0xa9   : > { %v2407_v6 = vand.u32 4294901760, %v314_v5  ;;  %v433_v7 = vand.u32 4294901760, %v2403_v3 }
  0xab   : > { %v2411_v8 = vsub.f32 %v314_v5, %v2407_v6  ;;  %1888 = vmatmul.mubr.f32.vlgmr.msra.gmra.mxu1 %v2407_v6  ;;  %v295_v9 = vpop.trf.xlu0  ;;  %v434_v10 = vsub.f32 %v2403_v3, %v433_v7 }
  0xac   : > { %v317_v14 = vsel %vm309_vm0, %v295_v9, 0  ;;  %1952 = vmatpush3.msra.mxu1 %v2276_v11 }
  0xad   : > { %v443_v15 = vand.u32 4294901760, %v2411_v8  ;;  %v2420_v18 = vand.u32 4294901760, %v317_v14  ;;  %v435_v19 = vand.u32 4294901760, %v434_v10  ;;  %1953 = vmatprep.subr.mxu1 %v2278_v12 }
  0xae   : > { %1954 = vmatpush3.msra.mxu1 %v2278_v12 }
  0xaf   : > { %v2425_v20 = vsub.f32 %v317_v14, %v2420_v18  ;;  %1847 = vmatprep.mubr.f32.mxu0 %v435_v19  ;;  %1890 = vmatprep.mubr.f32.mxu1 %v2420_v18  ;;  %v296_v21 = vpop.trf.xlu0  ;;  %v444_v30 = vsub.f32 %v2411_v8, %v443_v15 }
  0xb0   : > { %v320_v37 = vsel %vm309_vm0, %v296_v21, 0  ;;  %1955 = vmatprep.subr.mxu1 %v2280_v13 }
  0xb1   : > { %v453_v38 = vand.u32 4294901760, %v2425_v20  ;;  %v2434_v39 = vand.u32 4294901760, %v320_v37  ;;  %v445_v42 = vand.u32 4294901760, %v444_v30  ;;  %1956 = vmatpush3.msra.mxu1 %v2280_v13 }
  0xb2   : > { %1957 = vmatprep.subr.mxu1 %v2288_v16 }
  0xb3   : > { %v2439_v43 = vsub.f32 %v320_v37, %v2434_v39  ;;  %1848 = vmatmul.mubr.f32.vlgmr.msra.gmra.mxu0 %v445_v42  ;;  %1891 = vmatmul.mubr.f32.gmra.mxu1 %v2434_v39  ;;  %v297_v44 = vpop.trf.xlu0  ;;  %v454_v45 = vsub.f32 %v2425_v20, %v453_v38 }
  0xb4   : > { %v323_v47 = vsel %vm309_vm0, %v297_v44, 0  ;;  %1912 = vmatpush3.msra.mxu0 %v2305_v22  ;;  %1958 = vmatpush3.msra.mxu1 %v2288_v16 }
  0xb5   : > { %v463_v48 = vand.u32 4294901760, %v2439_v43  ;;  %v2449_v50 = vand.u32 4294901760, %v323_v47  ;;  %v455_v51 = vand.u32 4294901760, %v454_v45  ;;  %1913 = vmatprep.subr.mxu0 %v2308_v23  ;;  %1959 = vmatprep.subr.mxu1 %v2290_v17 }
  0xb6   : > { %1914 = vmatpush3.msra.mxu0 %v2308_v23  ;;  %1960 = vmatpush3.msra.mxu1 %v2290_v17 }
  0xb7   : > { %v2456_v52 = vsub.f32 %v323_v47, %v2449_v50  ;;  %1850 = vmatprep.mubr.f32.mxu0 %v455_v51  ;;  %1893 = vmatprep.mubr.f32.mxu1 %v2449_v50  ;;  %v298_v22 = vpop.trf.xlu0  ;;  %v464_v54 = vsub.f32 %v2439_v43, %v463_v48 }
  0xb8   : > { %v326_v55 = vsel %vm309_vm0, %v298_v22, 0  ;;  %1915 = vmatprep.subr.mxu0 %v2311_v24  ;;  %1961 = vmatprep.subr.mxu1 %v2314_v25 }
  0xb9   : > { %v473_v23 = vand.u32 4294901760, %v2456_v52  ;;  %v2466_v56 = vand.u32 4294901760, %v326_v55  ;;  %v465_v57 = vand.u32 4294901760, %v464_v54  ;;  %1916 = vmatpush3.msra.mxu0 %v2311_v24  ;;  %1962 = vmatpush3.msra.mxu1 %v2314_v25 }
  0xba   : > { %1917 = vmatprep.subr.mxu0 %v2317_v26  ;;  %1963 = vmatprep.subr.mxu1 %v2323_v28 }
  0xbb   : > { %v2473_v58 = vsub.f32 %v326_v55, %v2466_v56  ;;  %1851 = vmatmul.mubr.f32.gmra.mxu0 %v465_v57  ;;  %1894 = vmatmul.mubr.f32.gmra.mxu1 %v2466_v56  ;;  %v299_v59 = vpop.trf.xlu0  ;;  %v474_v60 = vsub.f32 %v2456_v52, %v473_v23 }
  0xbc   : > { %v329_v61 = vsel %vm309_vm0, %v299_v59, 0  ;;  %1918 = vmatpush3.msra.mxu0 %v2317_v26  ;;  %1964 = vmatpush3.msra.mxu1 %v2323_v28 }
  0xbd   : > { %v483_v24 = vand.u32 4294901760, %v2473_v58  ;;  %v2483_v62 = vand.u32 4294901760, %v329_v61  ;;  %v475_v63 = vand.u32 4294901760, %v474_v60  ;;  %1919 = vmatprep.subr.mxu0 %v2320_v27  ;;  %1965 = vmatprep.subr.mxu1 %v2325_v29 }
  0xbe   : > { %1920 = vmatpush3.msra.mxu0 %v2320_v27  ;;  %1966 = vmatpush3.msra.mxu1 %v2325_v29 }
  0xbf   : > { %v2490_v0 = vsub.f32 %v329_v61, %v2483_v62  ;;  %1853 = vmatprep.mubr.f32.mxu0 %v475_v63  ;;  %1896 = vmatprep.mubr.f32.mxu1 %v2483_v62  ;;  %v300_v26 = vpop.trf.xlu0  ;;  %v484_v1 = vsub.f32 %v2473_v58, %v483_v24 }
  0xc0   : > { %v332_v4 = vsel %vm309_vm0, %v300_v26, 0  ;;  %1921 = vmatprep.subr.mxu0 %v2339_v34  ;;  %2031 = vmatprep.subr.mxu1 %v2276_v11 }
  0xc1   : > { %v493_v27 = vand.u32 4294901760, %v2490_v0  ;;  %v2500_v5 = vand.u32 4294901760, %v332_v4  ;;  %v485_v9 = vand.u32 4294901760, %v484_v1  ;;  %1922 = vmatpush3.msra.mxu0 %v2339_v34 }
  0xc2   : > { %1923 = vmatprep.subr.mxu0 %v2356_v40 }
  0xc3   : > { %v2505_v10 = vsub.f32 %v332_v4, %v2500_v5  ;;  %1854 = vmatmul.mubr.f32.gmra.mxu0 %v485_v9  ;;  %1897 = vmatmul.mubr.f32.gmra.mxu1 %v2500_v5  ;;  %v301_v14 = vpop.trf.xlu0  ;;  %v494_v19 = vsub.f32 %v2490_v0, %v493_v27 }
  0xc4   : > { %v335_v21 = vsel %vm309_vm0, %v301_v14, 0  ;;  %1924 = vmatpush3.msra.mxu0 %v2356_v40 }
  0xc5   : > { %v503_v30 = vand.u32 4294901760, %v2505_v10  ;;  %v2514_v34 = vand.u32 4294901760, %v335_v21  ;;  %v495_v37 = vand.u32 4294901760, %v494_v19  ;;  %1925 = vmatprep.subr.mxu0 %v2360_v41 }
  0xc6   : > { %1926 = vmatpush3.msra.mxu0 %v2360_v41 }
  0xc7   : > { %v2519_v42 = vsub.f32 %v335_v21, %v2514_v34  ;;  %1856 = vmatprep.mubr.f32.mxu0 %v495_v37  ;;  %1899 = vmatprep.mubr.f32.mxu1 %v2514_v34  ;;  %v302_v44 = vpop.trf.xlu0  ;;  %v504_v40 = vsub.f32 %v2505_v10, %v503_v30 }
  0xc8   : > { %v338_v45 = vsel %vm309_vm0, %v302_v44, 0  ;;  %1991 = vmatprep.subr.mxu0 %v2329_v31 }
  0xc9   : > { %v2967_v47 = vand.u32 4294901760, %v2519_v42  ;;  %v2528_v51 = vand.u32 4294901760, %v338_v45  ;;  %v505_v41 = vand.u32 4294901760, %v504_v40 }
  0xcb   : > { %v2531_v22 = vsub.f32 %v338_v45, %v2528_v51  ;;  %1857 = vmatmul.mubr.f32.gmra.mxu0 %v505_v41  ;;  %1900 = vmatmul.mubr.f32.gmra.mxu1 %v2528_v51  ;;  %v303_v54 = vpop.trf.xlu0  ;;  %v514_v55 = vsub.f32 %v2519_v42, %v2967_v47 }
  0xcc   : > { %v341_v57 = vsel %vm309_vm0, %v303_v54, 0 }
  0xcd   : > { %v2966_v59 = vand.u32 4294901760, %v2531_v22  ;;  %v2539_v60 = vand.u32 4294901760, %v341_v57  ;;  %v515_v61 = vand.u32 4294901760, %v514_v55 }
  0xcf   : > { %v2542_v63 = vsub.f32 %v341_v57, %v2539_v60  ;;  %1859 = vmatprep.mubr.f32.mxu0 %v515_v61  ;;  %1902 = vmatprep.mubr.f32.mxu1 %v2539_v60  ;;  %v304_v26 = vpop.trf.xlu0  ;;  %v524_v1 = vsub.f32 %v2531_v22, %v2966_v59 }
  0xd0   : > { %v344_v4 = vsel %vm309_vm0, %v304_v26, 0 }
  0xd1   : > { %v2964_v9 = vand.u32 4294901760, %v2542_v63  ;;  %v2550_v14 = vand.u32 4294901760, %v344_v4  ;;  %v525_v19 = vand.u32 4294901760, %v524_v1 }
  0xd3   : > { %v2553_v21 = vsub.f32 %v344_v4, %v2550_v14  ;;  %1860 = vmatmul.mubr.f32.gmra.mxu0 %v525_v19  ;;  %1903 = vmatmul.mubr.f32.gmra.mxu1 %v2550_v14  ;;  %v305_v37 = vpop.trf.xlu0  ;;  %v534_v44 = vsub.f32 %v2542_v63, %v2964_v9 }
  0xd4   : > { %v347_v40 = vsel %vm309_vm0, %v305_v37, 0 }
  0xd5   : > { %v2963_v45 = vand.u32 4294901760, %v2553_v21  ;;  %v2561_v41 = vand.u32 4294901760, %v347_v40  ;;  %v535_v54 = vand.u32 4294901760, %v534_v44 }
  0xd7   : > { %v2564_v55 = vsub.f32 %v347_v40, %v2561_v41  ;;  %1862 = vmatprep.mubr.f32.mxu0 %v535_v54  ;;  %1905 = vmatprep.mubr.f32.mxu1 %v2561_v41  ;;  %v306_v57 = vpop.trf.xlu0  ;;  %v544_v61 = vsub.f32 %v2553_v21, %v2963_v45 }
  0xd8   : > { %v350_v26 = vsel %vm309_vm0, %v306_v57, 0 }
  0xd9   : > { %v2965_v1 = vand.u32 4294901760, %v2564_v55  ;;  %v2572_v4 = vand.u32 4294901760, %v350_v26  ;;  %v545_v19 = vand.u32 4294901760, %v544_v61 }
  0xdb   : > { %v2575_v37 = vsub.f32 %v350_v26, %v2572_v4  ;;  %1863 = vmatmul.mubr.f32.gmra.mxu0 %v545_v19  ;;  %1906 = vmatmul.mubr.f32.gmra.mxu1 %v2572_v4  ;;  %v307_v44 = vpop.trf.xlu0  ;;  %v554_v40 = vsub.f32 %v2564_v55, %v2965_v1 }
  0xdc   : > { %v353_v54 = vsel %vm309_vm0, %v307_v44, 0 }
  0xdd   : > { %v2968_v57 = vand.u32 4294901760, %v2575_v37  ;;  %v2583_v45 = vand.u32 4294901760, %v353_v54  ;;  %v555_v9 = vand.u32 4294901760, %v554_v40 }
  0xdf   : > { %v2586_v61 = vsub.f32 %v353_v54, %v2583_v45  ;;  %1865 = vmatprep.mubr.f32.mxu0 %v555_v9  ;;  %1908 = vmatprep.mubr.f32.mxu1 %v2583_v45  ;;  %v308_v26 = vpop.trf.xlu0  ;;  %v564_v19 = vsub.f32 %v2575_v37, %v2968_v57 }
  0xe0   : > { %v356_v1 = vsel %vm309_vm0, %v308_v26, 0 }
  0xe1   : > { %v573_v44 = vand.u32 4294901760, %v2586_v61  ;;  %v2594_v59 = vand.u32 4294901760, %v356_v1  ;;  %v565_v47 = vand.u32 4294901760, %v564_v19 }
  0xe3   : > { %v2597_v40 = vsub.f32 %v356_v1, %v2594_v59  ;;  %1866 = vmatmul.mubr.f32.gmra.mxu0 %v565_v47  ;;  %1909 = vmatmul.mubr.f32.gmra.mxu1 %v2594_v59  ;;  %v574_v9 = vsub.f32 %v2586_v61, %v573_v44 }
  0xe4   : > { %1967 = vmatprep.mubr.f32.mxu1 %v433_v7 }
  0xe5   : > { %v583_v54 = vand.u32 4294901760, %v2597_v40  ;;  %v575_v57 = vand.u32 4294901760, %v574_v9 }
  0xe7   : > { %1868 = vmatprep.mubr.f32.mxu0 %v575_v57  ;;  %1968 = vmatmul.mubr.f32.vlgmr.msra.gmra.mxu1 %v443_v15  ;;  %v584_v26 = vsub.f32 %v2597_v40, %v583_v54 }
  0xe8   : > { %1970 = vmatprep.mubr.f32.mxu1 %v453_v38  ;;  %2032 = vmatpush3.msra.mxu1 %v2276_v11  ;;  %v2969_v11 = vand.u32 4294901760, %v2519_v42 }
  0xe9   : > { %v585_v47 = vand.u32 4294901760, %v584_v26  ;;  %2033 = vmatprep.subr.mxu1 %v2278_v12 }
  0xea   : > { %2034 = vmatpush3.msra.mxu1 %v2278_v12  ;;  %v2970_v12 = vand.u32 4294901760, %v2531_v22 }
  0xeb   : > { %1869 = vmatmul.mubr.f32.gmra.mxu0 %v585_v47  ;;  %1971 = vmatmul.mubr.f32.gmra.mxu1 %v463_v48 }
  0xec   : > { %1927 = vmatprep.mubr.f32.mxu0 %v2403_v3  ;;  %1973 = vmatprep.mubr.f32.mxu1 %v473_v23 }
  0xed   : > { %2035 = vmatprep.subr.mxu1 %v2280_v13 }
  0xee   : > { %2036 = vmatpush3.msra.mxu1 %v2280_v13  ;;  %v2971_v13 = vand.u32 4294901760, %v2542_v63 }
  0xef   : > { %1928 = vmatmul.mubr.f32.vlgmr.msra.gmra.mxu0 %v2411_v8  ;;  %1974 = vmatmul.mubr.f32.gmra.mxu1 %v483_v24 }
  0xf0   : > { %1992 = vmatpush3.msra.mxu0 %v2329_v31  ;;  %1930 = vmatprep.mubr.f32.mxu0 %v2425_v20  ;;  %v2973_v31 = vand.u32 4294901760, %v2564_v55 }
  0xf1   : > { %1976 = vmatprep.mubr.f32.mxu1 %v493_v27  ;;  %1993 = vmatprep.subr.mxu0 %v2332_v32 }
  0xf2   : > { %1994 = vmatpush3.msra.mxu0 %v2332_v32  ;;  %2037 = vmatprep.subr.mxu1 %v2288_v16 }
  0xf3   : > { %1931 = vmatmul.mubr.f32.gmra.mxu0 %v2439_v43  ;;  %1977 = vmatmul.mubr.f32.gmra.mxu1 %v503_v30 }
  0xf4   : > { %1933 = vmatprep.mubr.f32.mxu0 %v2456_v52  ;;  %1979 = vmatprep.mubr.f32.mxu1 %v2969_v11 }
  0xf5   : > { %1995 = vmatprep.subr.mxu0 %v2335_v33  ;;  %2038 = vmatpush3.msra.mxu1 %v2288_v16  ;;  %v2972_v16 = vand.u32 4294901760, %v2553_v21 }
  0xf6   : > { %1996 = vmatpush3.msra.mxu0 %v2335_v33  ;;  %2039 = vmatprep.subr.mxu1 %v2290_v17 }
  0xf7   : > { %1934 = vmatmul.mubr.f32.gmra.mxu0 %v2473_v58  ;;  %1980 = vmatmul.mubr.f32.gmra.mxu1 %v2970_v12 }
  0xf8   : > { %1936 = vmatprep.mubr.f32.mxu0 %v2490_v0  ;;  %1982 = vmatprep.mubr.f32.mxu1 %v2971_v13 }
  0xf9   : > { %1997 = vmatprep.subr.mxu0 %v2342_v35  ;;  %2040 = vmatpush3.msra.mxu1 %v2290_v17  ;;  %v2974_v17 = vand.u32 4294901760, %v2575_v37 }
  0xfa   : > { %1998 = vmatpush3.msra.mxu0 %v2342_v35  ;;  %2041 = vmatprep.subr.mxu1 %v2314_v25 }
  0xfb   : > { %1937 = vmatmul.mubr.f32.gmra.mxu0 %v2505_v10  ;;  %1983 = vmatmul.mubr.f32.gmra.mxu1 %v2972_v16 }
  0xfc   : > { %1939 = vmatprep.mubr.f32.mxu0 %v2519_v42  ;;  %1985 = vmatprep.mubr.f32.mxu1 %v2973_v31 }
  0xfd   : > { %1999 = vmatprep.subr.mxu0 %v2345_v36  ;;  %2042 = vmatpush3.msra.mxu1 %v2314_v25 }
  0xfe   : > { %2000 = vmatpush3.msra.mxu0 %v2345_v36  ;;  %2043 = vmatprep.subr.mxu1 %v2323_v28 }
  0xff   : > { %1940 = vmatmul.mubr.f32.gmra.mxu0 %v2531_v22  ;;  %1986 = vmatmul.mubr.f32.gmra.mxu1 %v2974_v17 }
 0x100   : > { %1942 = vmatprep.mubr.f32.mxu0 %v2542_v63  ;;  %1988 = vmatprep.mubr.f32.mxu1 %v573_v44 }
 0x101   : > { %2001 = vmatprep.subr.mxu0 %v2366_v46  ;;  %2044 = vmatpush3.msra.mxu1 %v2323_v28 }
 0x102   : > { %2002 = vmatpush3.msra.mxu0 %v2366_v46  ;;  %2045 = vmatprep.subr.mxu1 %v2325_v29 }
 0x103   : > { %1943 = vmatmul.mubr.f32.gmra.mxu0 %v2553_v21  ;;  %1989 = vmatmul.mubr.f32.gmra.mxu1 %v583_v54 }
 0x104   : > { %1945 = vmatprep.mubr.f32.mxu0 %v2564_v55  ;;  %2047 = vmatprep.mubr.f32.mxu1 %v2400_v2 }
 0x105   : > { %2003 = vmatprep.subr.mxu0 %v2373_v49  ;;  %2046 = vmatpush3.msra.mxu1 %v2325_v29 }
 0x106   : > { %2004 = vmatpush3.msra.mxu0 %v2373_v49 }
 0x107   : > { %1946 = vmatmul.mubr.f32.gmra.mxu0 %v2575_v37  ;;  %2048 = vmatmul.mubr.f32.vlgmr.msra.gmra.mxu1 %v2407_v6 }
 0x108   : > { %1948 = vmatprep.mubr.f32.mxu0 %v2586_v61  ;;  %2050 = vmatprep.mubr.f32.mxu1 %v2420_v18 }
 0x109   : > { %2005 = vmatprep.subr.mxu0 %v2380_v53 }
 0x10a   : > { %2006 = vmatpush3.msra.mxu0 %v2380_v53 }
 0x10b   : > { %1949 = vmatmul.mubr.f32.gmra.mxu0 %v2597_v40  ;;  %2051 = vmatmul.mubr.f32.gmra.mxu1 %v2434_v39 }
 0x10c   : > { %2007 = vmatprep.mubr.f32.mxu0 %v2400_v2  ;;  %2053 = vmatprep.mubr.f32.mxu1 %v2449_v50 }
 0x10f   : > { %2008 = vmatmul.mubr.f32.vlgmr.msra.gmra.mxu0 %v2407_v6  ;;  %2054 = vmatmul.mubr.f32.gmra.mxu1 %v2466_v56 }
 0x110   : > { %2010 = vmatprep.mubr.f32.mxu0 %v2420_v18  ;;  %2056 = vmatprep.mubr.f32.mxu1 %v2483_v62 }
 0x113   : > { %2011 = vmatmul.mubr.f32.gmra.mxu0 %v2434_v39  ;;  %2057 = vmatmul.mubr.f32.gmra.mxu1 %v2500_v5 }
 0x114   : > { %2013 = vmatprep.mubr.f32.mxu0 %v2449_v50  ;;  %2059 = vmatprep.mubr.f32.mxu1 %v2514_v34 }
 0x117   : > { %2014 = vmatmul.mubr.f32.gmra.mxu0 %v2466_v56  ;;  %2060 = vmatmul.mubr.f32.gmra.mxu1 %v2528_v51 }
 0x118   : > { %2016 = vmatprep.mubr.f32.mxu0 %v2483_v62  ;;  %2062 = vmatprep.mubr.f32.mxu1 %v2539_v60 }
 0x11b   : > { %2017 = vmatmul.mubr.f32.gmra.mxu0 %v2500_v5  ;;  %2063 = vmatmul.mubr.f32.gmra.mxu1 %v2550_v14 }
 0x11c   : > { %2019 = vmatprep.mubr.f32.mxu0 %v2514_v34  ;;  %2065 = vmatprep.mubr.f32.mxu1 %v2561_v41 }
 0x11f   : > { %2020 = vmatmul.mubr.f32.gmra.mxu0 %v2528_v51  ;;  %2066 = vmatmul.mubr.f32.gmra.mxu1 %v2572_v4 }
 0x120   : > { %2022 = vmatprep.mubr.f32.mxu0 %v2539_v60  ;;  %2068 = vmatprep.mubr.f32.mxu1 %v2583_v45 }
 0x123   : > { %2023 = vmatmul.mubr.f32.gmra.mxu0 %v2550_v14  ;;  %2069 = vmatmul.mubr.f32.gmra.mxu1 %v2594_v59 }
 0x124   : > { %2025 = vmatprep.mubr.f32.mxu0 %v2561_v41 }
 0x127   : > { %2026 = vmatmul.mubr.f32.gmra.mxu0 %v2572_v4 }
 0x128   : > { %2028 = vmatprep.mubr.f32.mxu0 %v2583_v45 }
 0x12b   : > { %2029 = vmatmul.mubr.f32.gmra.mxu0 %v2594_v59 }
 0x16b   : > { %v2709_v25 = vpop.f32.mrf.mxu1 }
 0x16d   : > { %v2711_v28 = vpop.f32.mrf.mxu1 }
 0x173   : > { %v2713_v29 = vpop.f32.mrf.mxu1  ;;  %v2715_v32 = vpop.f32.mrf.mxu0 }
 0x174   : > { %v705_v31 = vadd.f32 %v2709_v25, %v2715_v32 }
 0x175   : > { %v2717_v33 = vpop.f32.mrf.mxu1  ;;  %v2719_v35 = vpop.f32.mrf.mxu0 }
 0x17b   : > { %v2721_v36 = vpop.f32.mrf.mxu1  ;;  %v2723_v46 = vpop.f32.mrf.mxu0 }
 0x17d   : > { %v2725_v49 = vpop.f32.mrf.mxu1  ;;  %v2727_v53 = vpop.f32.mrf.mxu0 }
 0x17e   : > { %v711_v25 = vadd.f32 %v2717_v33, %v2727_v53 }
 0x183   : > { %v2729_v2 = vpop.f32.mrf.mxu1  ;;  %v2731_v3 = vpop.f32.mrf.mxu0 }
 0x185   : > { %v2733_v6 = vpop.f32.mrf.mxu1  ;;  %v2735_v7 = vpop.f32.mrf.mxu0 }
 0x18b   : > { %v2737_v8 = vpop.f32.mrf.mxu1  ;;  %v2739_v15 = vpop.f32.mrf.mxu0 }
 0x18d   : > { %v2741_v18 = vpop.f32.mrf.mxu1  ;;  %v2743_v20 = vpop.f32.mrf.mxu0 }
 0x193   : > { %v2745_v38 = vpop.f32.mrf.mxu1  ;;  %v2747_v39 = vpop.f32.mrf.mxu0 }
 0x195   : > { %v2749_v43 = vpop.f32.mrf.mxu1  ;;  %v2751_v48 = vpop.f32.mrf.mxu0 }
 0x19b   : > { %v2753_v50 = vpop.f32.mrf.mxu1  ;;  %v2755_v52 = vpop.f32.mrf.mxu0 }
 0x19d   : > { %v2757_v23 = vpop.f32.mrf.mxu1  ;;  %v2759_v56 = vpop.f32.mrf.mxu0 }
 0x1a3   : > { %v2761_v58 = vpop.f32.mrf.mxu1  ;;  %v2763_v24 = vpop.f32.mrf.mxu0 }
 0x1a4   : > { %2975 = vst [vmem:[#allocation3_spill] sm:$0xff] %v2761_v58 }
 0x1a5   : > { %v2765_v62 = vpop.f32.mrf.mxu1  ;;  %v2767_v27 = vpop.f32.mrf.mxu0 }
 0x1a6   : > { %2976 = vst [vmem:[#allocation4_spill] sm:$0xff] %v2765_v62 }
 0x1a7   : > { %v1969_v0 = vpop.f32.mrf.mxu1 }
 0x1a9   : > { %v1062_v5 = vpop.f32.mrf.mxu1 }
 0x1ab   : > { %v2769_v10 = vpop.f32.mrf.mxu0  ;;  %v2771_v30 = vpop.f32.mrf.mxu1 }
 0x1ac   : > { %2977 = vst [vmem:[#allocation5_spill] sm:$0xff] %v2769_v10 }
 0x1ad   : > { %v2773_v34 = vpop.f32.mrf.mxu0  ;;  %v2775_v42 = vpop.f32.mrf.mxu1 }
 0x1ae   : > { %2978 = vst [vmem:[#allocation6_spill] sm:$0xff] %v2773_v34  ;;  %v717_v34 = vadd.f32 %v2713_v29, %v2723_v46  ;;  %v723_v29 = vadd.f32 %v2725_v49, %v2735_v7 }
 0x1af   : > { %v1929_v51 = vpop.f32.mrf.mxu0  ;;  %v2777_v22 = vpop.f32.mrf.mxu1 }
 0x1b1   : > { %v876_v59 = vpop.f32.mrf.mxu0  ;;  %v2779_v60 = vpop.f32.mrf.mxu1 }
 0x1b3   : > { %v1932_v63 = vpop.f32.mrf.mxu0  ;;  %v2781_v14 = vpop.f32.mrf.mxu1 }
 0x1b4   : > { %v898_v32 = vadd.f32 %v1932_v63, %v717_v34 }
 0x1b5   : > { %v890_v21 = vpop.f32.mrf.mxu0  ;;  %v2783_v45 = vpop.f32.mrf.mxu1 }
 0x1b7   : > { %v1935_v41 = vpop.f32.mrf.mxu0  ;;  %v2785_v55 = vpop.f32.mrf.mxu1 }
 0x1b9   : > { %v904_v1 = vpop.f32.mrf.mxu0  ;;  %v2787_v4 = vpop.f32.mrf.mxu1 }
 0x1ba   : > { %v905_v63 = vadd.f32 %v904_v1, %v723_v29 }
 0x1bb   : > { %v2789_v37 = vpop.f32.mrf.mxu0  ;;  %v2791_v57 = vpop.f32.mrf.mxu1 }
 0x1bc   : > { %2979 = vst [vmem:[#allocation7_spill] sm:$0xff] %v2791_v57 }
 0x1bd   : > { %v2793_v61 = vpop.f32.mrf.mxu0  ;;  %v2795_v19 = vpop.f32.mrf.mxu1 }
 0x1be   : > { %2980 = vst [vmem:[#allocation8_spill] sm:$0xff] %v2795_v19 }
 0x1bf   : > { %v2797_v44 = vpop.f32.mrf.mxu0  ;;  %v2799_v40 = vpop.f32.mrf.mxu1 }
 0x1c0   : > { %2981 = vst [vmem:[#allocation9_spill] sm:$0xff] %v2799_v40  ;;  %v699_v40 = vadd.f32 %v2711_v28, %v2719_v35  ;;  %v729_v28 = vadd.f32 %v2721_v36, %v2731_v3  ;;  %v1087_v36 = vadd.f32 %v2771_v30, %v898_v32  ;;  %v741_v3 = vadd.f32 %v2729_v2, %v2739_v15 }
 0x1c1   : > { %v2801_v9 = vpop.f32.mrf.mxu0  ;;  %v2803_v54 = vpop.f32.mrf.mxu1  ;;  %v735_v2 = vadd.f32 %v2733_v6, %v2743_v20  ;;  %v1095_v6 = vadd.f32 %v2779_v60, %v905_v63 }
 0x1c2   : > { %2982 = vst [vmem:[#allocation10_spill] sm:$0xff] %v2803_v54  ;;  %v877_v19 = vadd.f32 %v876_v59, %v699_v40  ;;  %v912_v46 = vadd.f32 %v1935_v41, %v729_v28  ;;  %v2839_v59 = vld [vmem:[%s2961_s2] ss:$0 sm:$0xff] }
 0x1c3   : > { %v2807_v26 = vpop.f32.mrf.mxu0  ;;  %v2809_v47 = vpop.f32.mrf.mxu1  ;;  %v919_v20 = vadd.f32 %v2793_v61, %v735_v2 }
 0x1c4   : > { %2983 = vst [vmem:[#allocation11_spill] sm:$0xff] %v2809_v47  ;;  %v884_v47 = vadd.f32 %v1929_v51, %v705_v31  ;;  %v891_v31 = vadd.f32 %v890_v21, %v711_v25  ;;  %v1063_v57 = vadd.f32 %v1062_v5, %v877_v19  ;;  %v1103_v1 = vadd.f32 %v2777_v22, %v912_v46 }
 0x1c5   : > { %v2811_v11 = vpop.f32.mrf.mxu0  ;;  %v2813_v12 = vpop.f32.mrf.mxu1  ;;  %v759_v46 = vadd.f32 %v2749_v43, %v2759_v56 }
 0x1c6   : > { %2984 = vst [vmem:[#allocation12_spill] sm:$0xff] %v2813_v12  ;;  %v1079_v30 = vadd.f32 %v2775_v42, %v891_v31 }
 0x1c7   : > { %v2816_v13 = vpop.f32.mrf.mxu0  ;;  %v2049_v16 = vpop.f32.mrf.mxu1  ;;  %v947_v43 = vadd.f32 %v2811_v11, %v759_v46  ;;  %v2987_v11 = vld [vmem:[#allocation7_spill] sm:$0xff] }
 0x1c9   : > { %v2820_v17 = vpop.f32.mrf.mxu0  ;;  %v1446_v54 = vpop.f32.mrf.mxu1 }
 0x1ca   : > { %2985 = vst [vmem:[#allocation13_spill] sm:$0xff] %v2820_v17  ;;  %v1071_v17 = vadd.f32 %v1969_v0, %v884_v47  ;;  %v753_v47 = vadd.f32 %v2737_v8, %v2747_v39 }
 0x1cb   : > { %v2824_v62 = vpop.f32.mrf.mxu0  ;;  %v2052_v12 = vpop.f32.mrf.mxu1 }
 0x1cc   : > { %2986 = vst [vmem:[#allocation14_spill] sm:$0xff] %v2824_v62  ;;  %v940_v25 = vadd.f32 %v2797_v44, %v753_v47 }
 0x1cd   : > { %v2828_v58 = vpop.f32.mrf.mxu0  ;;  %v1458_v10 = vpop.f32.mrf.mxu1 }
 0x1cf   : > { %v2009_v35 = vpop.f32.mrf.mxu0  ;;  %v2055_v51 = vpop.f32.mrf.mxu1 }
 0x1d0   : > { %v1284_v62 = vadd.f32 %v2009_v35, %v1071_v17 }
 0x1d1   : > { %v1277_v33 = vpop.f32.mrf.mxu0  ;;  %v1470_v53 = vpop.f32.mrf.mxu1 }
 0x1d2   : > { %v1453_v0 = vadd.f32 %v2049_v16, %v1284_v62  ;;  %v1278_v34 = vadd.f32 %v1277_v33, %v1063_v57  ;;  %v926_v57 = vadd.f32 %v2789_v37, %v741_v3  ;;  %v1135_v33 = vadd.f32 %v2785_v55, %v940_v25 }
 0x1d3   : > { %v2012_v49 = vpop.f32.mrf.mxu0  ;;  %v2058_v7 = vpop.f32.mrf.mxu1  ;;  %v771_v3 = vadd.f32 %v2757_v23, %v2767_v27 }
 0x1d4   : > { %v1548_v5 = vadd.f32 %v2839_v59, %v1453_v0  ;;  %v1447_v21 = vadd.f32 %v1446_v54, %v1278_v34  ;;  %v1296_v62 = vadd.f32 %v2012_v49, %v1087_v36  ;;  %v1119_v28 = vadd.f32 %v2781_v14, %v926_v57 }
 0x1d5   : > { %v1289_v15 = vpop.f32.mrf.mxu0  ;;  %v1482_v41 = vpop.f32.mrf.mxu1 }
 0x1d6   : > { %1565 = vst.msk [vmem:[%s2847_s24 + $0x8] sm:$0xff] %vm1563_vm1, %v1548_v5  ;;  %v1547_v19 = vadd.f32 %v2839_v59, %v1447_v21  ;;  %v1465_v40 = vadd.f32 %v2052_v12, %v1296_v62  ;;  %v1290_v54 = vadd.f32 %v1289_v15, %v1079_v30  ;;  %v747_v12 = vadd.f32 %v2741_v18, %v2751_v48  ;;  %v2988_v5 = vld [vmem:[#allocation5_spill] sm:$0xff]  ;;  %v2989_v21 = vld [vmem:[#allocation3_spill] sm:$0xff] }
 0x1d7   : > { %v2015_v42 = vpop.f32.mrf.mxu0  ;;  %v2061_v16 = vpop.f32.mrf.mxu1  ;;  %v789_v62 = vadd.f32 %v2989_v21, %v2988_v5  ;;  %v2990_v30 = vld [vmem:[#allocation13_spill] sm:$0xff] }
 0x1d8   : > { %1564 = vst.msk [vmem:[%s2847_s24] sm:$0xff] %vm1563_vm1, %v1547_v19  ;;  %v1550_v22 = vadd.f32 %v2839_v59, %v1465_v40  ;;  %v1459_v37 = vadd.f32 %v1458_v10, %v1290_v54  ;;  %v1308_v17 = vadd.f32 %v2015_v42, %v1103_v1  ;;  %v765_v10 = vadd.f32 %v2745_v38, %v2755_v52  ;;  %v2991_v1 = vld [vmem:[#allocation8_spill] sm:$0xff]  ;;  %v2992_v19 = vld [vmem:[#allocation6_spill] sm:$0xff]  ;;  %v2994_v42 = vld [vmem:[#allocation9_spill] sm:$0xff] }
 0x1d9   : > { %v1301_v32 = vpop.f32.mrf.mxu0  ;;  %v1494_v8 = vpop.f32.mrf.mxu1  ;;  %v933_v35 = vadd.f32 %v2801_v9, %v747_v12  ;;  %v961_v2 = vadd.f32 %v2990_v30, %v771_v3  ;;  %v1143_v57 = vadd.f32 %v2991_v1, %v947_v43  ;;  %v2993_v40 = vld [vmem:[#allocation4_spill] sm:$0xff] }
 0x1da   : > { %1567 = vst.msk [vmem:[%s2847_s24 + $0x18] sm:$0xff] %vm1563_vm1, %v1550_v22  ;;  %v1549_v39 = vadd.f32 %v2839_v59, %v1459_v37  ;;  %v1477_v60 = vadd.f32 %v2055_v51, %v1308_v17  ;;  %v1302_v61 = vadd.f32 %v1301_v32, %v1095_v6  ;;  %v1111_v51 = vadd.f32 %v2783_v45, %v919_v20  ;;  %v2995_v6 = vld [vmem:[#allocation14_spill] sm:$0xff] }
 0x1db   : > { %v2018_v31 = vpop.f32.mrf.mxu0  ;;  %v2064_v18 = vpop.f32.mrf.mxu1  ;;  %v954_v38 = vadd.f32 %v2807_v26, %v765_v10  ;;  %v1127_v36 = vadd.f32 %v2787_v4, %v933_v35  ;;  %v783_v54 = vadd.f32 %v2993_v40, %v2992_v19  ;;  %v982_v20 = vadd.f32 %v2995_v6, %v789_v62  ;;  %v2996_v32 = vld [vmem:[#allocation10_spill] sm:$0xff] }
 0x1dc   : > { %1566 = vst.msk [vmem:[%s2847_s24 + $0x10] sm:$0xff] %vm1563_vm1, %v1549_v39  ;;  %v1552_v48 = vadd.f32 %v2839_v59, %v1477_v60  ;;  %v1471_v44 = vadd.f32 %v1470_v53, %v1302_v61  ;;  %v1320_v29 = vadd.f32 %v2018_v31, %v1119_v28  ;;  %v777_v53 = vadd.f32 %v2753_v50, %v2763_v24 }
 0x1dd   : > { %v1313_v14 = vpop.f32.mrf.mxu0  ;;  %v1506_v34 = vpop.f32.mrf.mxu1  ;;  %v975_v39 = vadd.f32 %v2828_v58, %v783_v54 }
 0x1de   : > { %1569 = vst.msk [vmem:[%s2847_s24 + $0x28] sm:$0xff] %vm1563_vm1, %v1552_v48  ;;  %v1551_v52 = vadd.f32 %v2839_v59, %v1471_v44  ;;  %v1489_v9 = vadd.f32 %v2058_v7, %v1320_v29  ;;  %v1314_v0 = vadd.f32 %v1313_v14, %v1111_v51  ;;  %v968_v63 = vadd.f32 %v2816_v13, %v777_v53  ;;  %v2997_v48 = vld [vmem:[#allocation11_spill] sm:$0xff] }
 0x1df   : > { %v2021_v45 = vpop.f32.mrf.mxu0  ;;  %v1151_v7 = vadd.f32 %v2987_v11, %v954_v38  ;;  %v2067_v15 = vpop.f32.mrf.mxu1  ;;  %v1183_v44 = vadd.f32 %v2997_v48, %v982_v20 }
 0x1e0   : > { %1568 = vst.msk [vmem:[%s2847_s24 + $0x20] sm:$0xff] %vm1563_vm1, %v1551_v52  ;;  %v1554_v56 = vadd.f32 %v2839_v59, %v1489_v9  ;;  %v1483_v55 = vadd.f32 %v1482_v41, %v1314_v0  ;;  %v1332_v26 = vadd.f32 %v2021_v45, %v1135_v33  ;;  %v2998_v33 = vld [vmem:[#allocation12_spill] sm:$0xff] }
 0x1e1   : > { %v1325_v49 = vpop.f32.mrf.mxu0  ;;  %v1518_v12 = vpop.f32.mrf.mxu1  ;;  %v1175_v38 = vadd.f32 %v2998_v33, %v975_v39 }
 0x1e2   : > { %1571 = vst.msk [vmem:[%s2847_s24 + $0x38] sm:$0xff] %vm1563_vm1, %v1554_v56  ;;  %v1553_v50 = vadd.f32 %v2839_v59, %v1483_v55  ;;  %v1501_v24 = vadd.f32 %v2061_v16, %v1332_v26  ;;  %v1326_v4 = vadd.f32 %v1325_v49, %v1127_v36  ;;  %v1167_v16 = vadd.f32 %v2994_v42, %v968_v63 }
 0x1e3   : > { %v2024_v41 = vpop.f32.mrf.mxu0  ;;  %v2070_v29 = vpop.f32.mrf.mxu1 }
 0x1e4   : > { %1570 = vst.msk [vmem:[%s2847_s24 + $0x30] sm:$0xff] %vm1563_vm1, %v1553_v50  ;;  %v1556_v23 = vadd.f32 %v2839_v59, %v1501_v24  ;;  %v1495_v27 = vadd.f32 %v1494_v8, %v1326_v4  ;;  %v1344_v13 = vadd.f32 %v2024_v41, %v1151_v7  ;;  %v1159_v8 = vadd.f32 %v2996_v32, %v961_v2 }
 0x1e5   : > { %v1337_v47 = vpop.f32.mrf.mxu0 }
 0x1e6   : > { %1573 = vst.msk [vmem:[%s2847_s24 + $0x48] sm:$0xff] %vm1563_vm1, %v1556_v23  ;;  %v1555_v22 = vadd.f32 %v2839_v59, %v1495_v27  ;;  %v1513_v37 = vadd.f32 %v2064_v18, %v1344_v13  ;;  %v1338_v17 = vadd.f32 %v1337_v47, %v1143_v57 }
 0x1e7   : > { %v2027_v25 = vpop.f32.mrf.mxu0 }
 0x1e8   : > { %1572 = vst.msk [vmem:[%s2847_s24 + $0x40] sm:$0xff] %vm1563_vm1, %v1555_v22  ;;  %v1558_v60 = vadd.f32 %v2839_v59, %v1513_v37  ;;  %v1507_v61 = vadd.f32 %v1506_v34, %v1338_v17  ;;  %v1356_v28 = vadd.f32 %v2027_v25, %v1167_v16  ;;  %v1530_v34 = vpop.f32.mrf.mxu1 }
 0x1e9   : > { %v1349_v10 = vpop.f32.mrf.mxu0 }
 0x1ea   : > { %1575 = vst.msk [vmem:[%s2847_s24 + $0x58] sm:$0xff] %vm1563_vm1, %v1558_v60  ;;  %v1557_v35 = vadd.f32 %v2839_v59, %v1507_v61  ;;  %v1525_v31 = vadd.f32 %v2067_v15, %v1356_v28  ;;  %v1350_v18 = vadd.f32 %v1349_v10, %v1159_v8 }
 0x1eb   : > { %v2030_v58 = vpop.f32.mrf.mxu0 }
 0x1ec   : > { %1574 = vst.msk [vmem:[%s2847_s24 + $0x50] sm:$0xff] %vm1563_vm1, %v1557_v35  ;;  %v1560_v51 = vadd.f32 %v2839_v59, %v1525_v31  ;;  %v1519_v46 = vadd.f32 %v1518_v12, %v1350_v18  ;;  %v1368_v14 = vadd.f32 %v2030_v58, %v1183_v44 }
 0x1ed   : > { %v1361_v52 = vpop.f32.mrf.mxu0 }
 0x1ee   : > { %1577 = vst.msk [vmem:[%s2847_s24 + $0x68] sm:$0xff] %vm1563_vm1, %v1560_v51  ;;  %v1559_v9 = vadd.f32 %v2839_v59, %v1519_v46  ;;  %v1537_v0 = vadd.f32 %v2070_v29, %v1368_v14  ;;  %v1362_v53 = vadd.f32 %v1361_v52, %v1175_v38 }
 0x1f0   : > { %1576 = vst.msk [vmem:[%s2847_s24 + $0x60] sm:$0xff] %vm1563_vm1, %v1559_v9  ;;  %v1562_v45 = vadd.f32 %v2839_v59, %v1537_v0  ;;  %v1531_v36 = vadd.f32 %v1530_v34, %v1362_v53 }
 0x1f2   : > { %1579 = vst.msk [vmem:[%s2847_s24 + $0x78] sm:$0xff] %vm1563_vm1, %v1562_v45  ;;  %v1561_v43 = vadd.f32 %v2839_v59, %v1531_v36 }
 0x1f4   : > { %1578 = vst.msk [vmem:[%s2847_s24 + $0x70] sm:$0xff] %vm1563_vm1, %v1561_v43 }
 0x1f5 PF: > { %s13_s18 = sadd.s32 1, %s2182_s18   ;;  %s2999_s12 = smov %s2162_s13 }
 0x1f6   : > { %p10_p12 = scmp.ge.s32.totalorder %s13_s18, 6   ;;  %s3000_s13 = smov %s2255_s25 }
 0x1f7   : > { %s3001_s14 = smov %s2174_s16  ;;  %s3002_s15 = smov %s2178_s17 }
 0x1f8   : > { %s3003_s16 = smov %s3006_s19  ;;  %s3004_s17 = smov %s3010_s20 }
 0x1f9   :  { %12 = sbr.rel (!%p10_p12) target bundleno = 4 (0x4), region = 105 }

</bundles_post_ra>
